<compile_context>
chip_gen: v7x
topology: tpu7x:2x2x1
jax: 0.10.0
libtpu: 0.0.40
codegen_flags: <defaults>
</compile_context>

<pallas_src>
import functools

import jax
import jax.numpy as jnp
import numpy as np
from jax.experimental import pallas as pl
from jax.experimental.pallas import tpu as pltpu

_LANE = 128


def _round_up(x, m):
    return (x + m - 1) // m * m


def _vmem_budget(block_bytes):
    """Per-kernel VMEM limit: double-buffered blocks + compiler slack."""
    budget = 2 * int(block_bytes) + (12 << 20)
    return int(min(max(budget, 20 << 20), 40 << 20))


def _pick_chunk(t_out):
    """Row-chunk used inside the conv kernel to bound live values."""
    if t_out <= 512:
        return t_out
    for c in (256, 512, 384, 128):
        if t_out % c == 0:
            return c
    return 256


def _pick_tq(t1):
    """T1 tile for the distance kernel (bounds padding waste)."""
    if t1 <= 512:
        return t1                      # single exact tile, no T1 padding
    best = None
    for cand in range(512, 127, -64):  # multiples of 64 in [128, 512]
        waste = _round_up(t1, cand) - t1
        if best is None or waste < best[0]:
            best = (waste, cand)
    return best[1]


# ----------------------------------------------------------------------------
# Pallas kernel 1: fused conv chain (k=3 conv + bias + ReLU, then k=1 convs)
# ----------------------------------------------------------------------------
def _conv_chain_kernel(x_ref, *refs, relus, t_out, chunk, mm_dtype):
    out_ref = refs[-1]
    wb = refs[:-1]                      # (w3, b3, w1, b1, [w1, b1])

    def one_chunk(base, rows):
        # one zero-padded window: rows+2 input rows -> rows output rows
        xw = x_ref[0, pl.ds(base, rows + 2), :]           # (rows+2, Cin_p)
        w3_ref, b3_ref = wb[0], wb[1]
        h = (jnp.dot(xw[0:rows], w3_ref[0],
                     preferred_element_type=jnp.float32)
             + jnp.dot(xw[1:rows + 1], w3_ref[1],
                       preferred_element_type=jnp.float32)
             + jnp.dot(xw[2:rows + 2], w3_ref[2],
                       preferred_element_type=jnp.float32)
             + b3_ref[...])
        if relus[0]:
            h = jnp.maximum(h, 0.0)
        idx = 2
        for li in range(1, len(relus)):                   # k=1 layers
            h = jnp.dot(h.astype(mm_dtype), wb[idx][...],
                        preferred_element_type=jnp.float32) + wb[idx + 1][...]
            if relus[li]:
                h = jnp.maximum(h, 0.0)
            idx += 2
        out_ref[0, pl.ds(base, rows), :] = h.astype(out_ref.dtype)

    n_full = t_out // chunk
    tail = t_out - n_full * chunk
    if n_full == 1:
        one_chunk(0, chunk)
    else:
        @pl.loop(0, n_full)
        def _(c):
            one_chunk(pl.multiple_of(c * chunk, 8), chunk)
    if tail:
        one_chunk(n_full * chunk, tail)


def _prep_conv3_weight(w, cin_p, cout_p, dtype):
    # (C_out, C_in, 3) -> (3, cin_p, cout_p), zero padded
    c_out, c_in, _ = w.shape
    wt = jnp.transpose(w, (2, 1, 0))
    return jnp.pad(wt, ((0, 0), (0, cin_p - c_in),
                        (0, cout_p - c_out))).astype(dtype)


def _prep_conv1_weight(w, cin_p, cout_p, dtype):
    c_out, c_in, _ = w.shape
    wt = jnp.transpose(w[:, :, 0])
    return jnp.pad(wt, ((0, cin_p - c_in), (0, cout_p - c_out))).astype(dtype)


def _prep_bias(b, cout_p):
    return jnp.pad(b.reshape(1, -1), ((0, 0), (0, cout_p - b.shape[0])))


def conv_chain(x_btc, layers, *, t_out, mm_dtype=jnp.bfloat16):
    """x_btc: (B, T, C_in).  layers: [(w, b, relu)]; first layer k=3, rest k=1
    (PyTorch layout (C_out, C_in, K)).  Returns (B, t_out, Cout_p) in mm_dtype
    with Cout_p = round_up(C_out, 128); pad channels carry exact zeros."""
    B, T, c_in = x_btc.shape
    assert t_out >= T
    cin_p = _round_up(c_in, _LANE)
    couts = [w.shape[0] for (w, _, _) in layers]
    couts_p = [_round_up(c, _LANE) for c in couts]
    cins_p = [cin_p] + couts_p[:-1]
    isz = jnp.dtype(mm_dtype).itemsize

    # single zero-padded copy: 1 halo row + (t_out - T + 1) tail rows,
    # channels padded to the lane width, already in the matmul dtype.
    xpad = jnp.pad(x_btc.astype(mm_dtype),
                   ((0, 0), (1, t_out + 1 - T), (0, cin_p - c_in)))

    args = [xpad]
    in_specs = [pl.BlockSpec((1, t_out + 2, cin_p), lambda b: (b, 0, 0))]
    relus = []
    blk_bytes = (t_out + 2) * cin_p * isz
    for li, (w, bvec, relu) in enumerate(layers):
        if li == 0:
            wp = _prep_conv3_weight(w, cins_p[0], couts_p[0], mm_dtype)
            in_specs.append(pl.BlockSpec(wp.shape, lambda b: (0, 0, 0)))
        else:
            wp = _prep_conv1_weight(w, cins_p[li], couts_p[li], mm_dtype)
            in_specs.append(pl.BlockSpec(wp.shape, lambda b: (0, 0)))
        bp = _prep_bias(bvec, couts_p[li])                 # f32 bias
        in_specs.append(pl.BlockSpec(bp.shape, lambda b: (0, 0)))
        args += [wp, bp]
        relus.append(bool(relu))
        blk_bytes += wp.size * isz + bp.size * 4

    cout_p = couts_p[-1]
    blk_bytes += t_out * cout_p * isz
    chunk = _pick_chunk(t_out)
    kern = functools.partial(_conv_chain_kernel, relus=tuple(relus),
                             t_out=t_out, chunk=chunk, mm_dtype=mm_dtype)
    return pl.pallas_call(
        kern,
        out_shape=jax.ShapeDtypeStruct((B, t_out, cout_p), mm_dtype),
        grid=(B,),
        in_specs=in_specs,
        out_specs=pl.BlockSpec((1, t_out, cout_p), lambda b: (b, 0, 0)),
        compiler_params=pltpu.CompilerParams(
            dimension_semantics=("parallel",),
            vmem_limit_bytes=_vmem_budget(blk_bytes)),
    )(*args)


# ----------------------------------------------------------------------------
# Pallas kernel 2: squared-L2 distance + prior/log_softmax + mask + softmax
# tiled over (batch, T1-tiles); T2 kept at its exact (unpadded) length.
# ----------------------------------------------------------------------------
def _dist_attn_kernel(*refs, temperature, use_prior, use_mask):
    i = 0
    q_ref = refs[i]; i += 1
    k_ref = refs[i]; i += 1
    m_ref = None
    if use_mask:
        m_ref = refs[i]; i += 1
    p_ref = None
    if use_prior:
        p_ref = refs[i]; i += 1
    attn_ref, logp_ref = refs[i], refs[i + 1]

    q = q_ref[0]                                            # (TQ, Cp)
    k = k_ref[0]                                            # (T2, Cp)
    # ||q - k||^2 = ||q||^2 + ||k||^2 - 2 q.k ; cross term on the MXU.
    qk = jax.lax.dot_general(q, k, (((1,), (1,)), ((), ())),
                             preferred_element_type=jnp.float32)   # (TQ, T2)
    kf = k.astype(jnp.float32)
    k2 = jax.lax.dot_general(jnp.ones((1, kf.shape[1]), jnp.float32), kf * kf,
                             (((1,), (1,)), ((), ())),
                             preferred_element_type=jnp.float32)   # (1, T2)

    keep = (m_ref[0] <= 0.5) if use_mask else None          # (1, T2) bool

    if use_prior:
        # ||q||^2 is row-constant -> cancels in both log_softmax and softmax.
        score = (-temperature) * (k2 - 2.0 * qk)             # (TQ, T2)
        mx = jnp.max(score, axis=1, keepdims=True)
        p1 = jnp.exp(score - mx)
        lse = mx + jnp.log(jnp.sum(p1, axis=1, keepdims=True))
        prior = p_ref[0].astype(jnp.float32) + 1e-8
        logp_ref[0] = score - lse + jnp.log(prior)
        # reuse the exponentials: softmax(log_softmax + log(prior)) ==
        # normalize(p1 * prior) over the kept columns.
        w = p1 * prior
        if keep is not None:
            w = jnp.where(keep, w, 0.0)
        denom = jnp.sum(w, axis=1, keepdims=True)
        inv = pl.reciprocal(denom, approx=True)
        inv = inv * (2.0 - denom * inv)                      # Newton step
        attn_ref[0] = w * inv
    else:
        qf = q.astype(jnp.float32)
        q2 = jnp.sum(qf * qf, axis=1, keepdims=True)         # (TQ, 1)
        score = (-temperature) * (q2 + k2 - 2.0 * qk)
        logp_ref[0] = score                                  # raw log-prob
        masked = jnp.where(keep, score, -jnp.inf) if keep is not None else score
        mx = jnp.max(masked, axis=1, keepdims=True)
        e = jnp.exp(masked - mx)
        denom = jnp.sum(e, axis=1, keepdims=True)
        inv = pl.reciprocal(denom, approx=True)
        inv = inv * (2.0 - denom * inv)
        attn_ref[0] = e * inv


def dist_attention(q_enc, k_enc, mask_f, prior, *, temperature, tq):
    B, T1q, Cp = q_enc.shape
    T2 = k_enc.shape[1]
    n_t = T1q // tq
    use_mask = mask_f is not None
    use_prior = prior is not None

    kern = functools.partial(_dist_attn_kernel, temperature=temperature,
                             use_prior=use_prior, use_mask=use_mask)
    in_specs = [pl.BlockSpec((1, tq, Cp), lambda b, t: (b, t, 0)),
                pl.BlockSpec((1, T2, Cp), lambda b, t: (b, 0, 0))]
    args = [q_enc, k_enc]
    blk_bytes = tq * Cp * q_enc.dtype.itemsize + T2 * Cp * k_enc.dtype.itemsize
    if use_mask:
        in_specs.append(pl.BlockSpec((1, 1, T2), lambda b, t: (b, 0, 0)))
        args.append(mask_f)
        blk_bytes += T2 * 4
    if use_prior:
        in_specs.append(pl.BlockSpec((1, tq, T2), lambda b, t: (b, t, 0)))
        args.append(prior)
        blk_bytes += tq * T2 * prior.dtype.itemsize
    blk_bytes += 2 * tq * T2 * 4

    return pl.pallas_call(
        kern,
        out_shape=(jax.ShapeDtypeStruct((B, T1q, T2), jnp.float32),
                   jax.ShapeDtypeStruct((B, T1q, T2), jnp.float32)),
        grid=(B, n_t),
        in_specs=in_specs,
        out_specs=(pl.BlockSpec((1, tq, T2), lambda b, t: (b, t, 0)),
                   pl.BlockSpec((1, tq, T2), lambda b, t: (b, t, 0))),
        compiler_params=pltpu.CompilerParams(
            dimension_semantics=("parallel", "parallel"),
            vmem_limit_bytes=_vmem_budget(blk_bytes)),
    )(*args)


# ----------------------------------------------------------------------------
# Parameter init (ConvNorm: xavier_uniform weights, PyTorch-default bias)
# ----------------------------------------------------------------------------
def _xavier_conv(key, c_out, c_in, ksize, gain):
    fan_in, fan_out = c_in * ksize, c_out * ksize
    a = gain * np.sqrt(6.0 / (fan_in + fan_out))
    return jax.random.uniform(key, (c_out, c_in, ksize), jnp.float32, -a, a)


def _bias_init(key, c_out, c_in, ksize):
    bound = 1.0 / np.sqrt(c_in * ksize)
    return jax.random.uniform(key, (c_out,), jnp.float32, -bound, bound)


def init_params(rng, n_mel, n_text, n_att):
    ks = jax.random.split(rng, 10)
    relu_gain = float(np.sqrt(2.0))
    return {
        "key_w1": _xavier_conv(ks[0], 2 * n_text, n_text, 3, relu_gain),
        "key_b1": _bias_init(ks[1], 2 * n_text, n_text, 3),
        "key_w2": _xavier_conv(ks[2], n_att, 2 * n_text, 1, 1.0),
        "key_b2": _bias_init(ks[3], n_att, 2 * n_text, 1),
        "q_w1": _xavier_conv(ks[4], 2 * n_mel, n_mel, 3, relu_gain),
        "q_b1": _bias_init(ks[5], 2 * n_mel, n_mel, 3),
        "q_w2": _xavier_conv(ks[6], n_mel, 2 * n_mel, 1, 1.0),
        "q_b2": _bias_init(ks[7], n_mel, 2 * n_mel, 1),
        "q_w3": _xavier_conv(ks[8], n_att, n_mel, 1, 1.0),
        "q_b3": _bias_init(ks[9], n_att, n_mel, 1),
    }


# ----------------------------------------------------------------------------
# AlignmentEncoder.forward
# ----------------------------------------------------------------------------
def alignment_encoder_forward(params, queries, keys, mask=None, attn_prior=None,
                              temperature=0.0005, mm_dtype=jnp.bfloat16):
    """queries: (B, n_mel, T1), keys: (B, n_text, T2), mask: (B, T2, 1) bool,
    attn_prior: (B, T1, T2).  Returns (attn, attn_logprob): B x 1 x T1 x T2.
    mm_dtype=bfloat16 (default) runs all MXU operands / intermediates in bf16
    with f32 accumulation; pass jnp.float32 for bit-faithful reference math."""
    B, _, T1 = queries.shape
    T2 = keys.shape[2]
    q = jnp.transpose(queries, (0, 2, 1))                   # (B, T1, C)
    k = jnp.transpose(keys, (0, 2, 1))                      # (B, T2, C)

    tq = _pick_tq(T1)
    T1q = _round_up(T1, tq)                                  # == T1 iff one tile

    # fused conv chains; outputs come out already at the tiled length T1q / T2.
    k_enc = conv_chain(k, [(params["key_w1"], params["key_b1"], True),
                           (params["key_w2"], params["key_b2"], False)],
                       t_out=T2, mm_dtype=mm_dtype)          # (B, T2, Cp)
    q_enc = conv_chain(q, [(params["q_w1"], params["q_b1"], True),
                           (params["q_w2"], params["q_b2"], True),
                           (params["q_w3"], params["q_b3"], False)],
                       t_out=T1q, mm_dtype=mm_dtype)         # (B, T1q, Cp)
    assert k_enc.shape[-1] == q_enc.shape[-1]

    mask_f = None
    if mask is not None:
        mask_f = jnp.transpose(mask, (0, 2, 1)).astype(jnp.float32)  # (B,1,T2)

    prior_in = None
    if attn_prior is not None:
        prior_in = attn_prior.astype(jnp.float32)
        if T1q > T1:  # thin T1-only pad (never padded along T2)
            prior_in = jnp.pad(prior_in, ((0, 0), (0, T1q - T1), (0, 0)),
                               constant_values=1.0)

    attn_p, logp_p = dist_attention(q_enc, k_enc, mask_f, prior_in,
                                    temperature=temperature, tq=tq)
    if T1q > T1:
        return attn_p[:, None, :T1, :], logp_p[:, None, :T1, :]
    return attn_p[:, None], logp_p[:, None]


# ----------------------------------------------------------------------------
# Pure-JAX reference (torch semantics) for correctness check
# ----------------------------------------------------------------------------
def _conv1d_ref(x_nct, w, b, relu):
    pad = (w.shape[2] - 1) // 2
    y = jax.lax.conv_general_dilated(x_nct, w, window_strides=(1,),
                                     padding=[(pad, pad)],
                                     dimension_numbers=("NCH", "OIH", "NCH"))
    y = y + b[None, :, None]
    return jnp.maximum(y, 0.0) if relu else y


def reference_forward(params, queries, keys, mask, attn_prior, temperature):
    k_enc = _conv1d_ref(_conv1d_ref(keys, params["key_w1"], params["key_b1"], True),
                        params["key_w2"], params["key_b2"], False)
    q_h = _conv1d_ref(queries, params["q_w1"], params["q_b1"], True)
    q_h = _conv1d_ref(q_h, params["q_w2"], params["q_b2"], True)
    q_enc = _conv1d_ref(q_h, params["q_w3"], params["q_b3"], False)
    attn = (q_enc[:, :, :, None] - k_enc[:, :, None, :]) ** 2
    attn = -temperature * attn.sum(1, keepdims=True)
    if attn_prior is not None:
        attn = jax.nn.log_softmax(attn, axis=3) + jnp.log(attn_prior[:, None] + 1e-8)
    logp = attn
    if mask is not None:
        m = jnp.transpose(mask, (0, 2, 1))[:, :, None, :]
        attn = jnp.where(m, -jnp.inf, attn)
    return jax.nn.softmax(attn, axis=3), logp


if __name__ == "__main__":
    rng = jax.random.PRNGKey(0)
    B, n_mel, n_text, n_att = 2, 16, 32, 16
    T1, T2 = 16, 8
    r_p, r_q, r_k, r_prior, r_q2, r_k2, r_p2 = jax.random.split(rng, 7)

    params = init_params(r_p, n_mel, n_text, n_att)
    queries = jax.random.normal(r_q, (B, n_mel, T1), jnp.float32)      # B x C x T1
    keys = jax.random.normal(r_k, (B, n_text, T2), jnp.float32)        # B x C2 x T2
    key_lens = jnp.array([T2, T2 - 2])
    mask = (jnp.arange(T2)[None, :] >= key_lens[:, None])[:, :, None]  # B x T2 x 1
    attn_prior = jax.random.uniform(r_prior, (B, T1, T2), jnp.float32, 0.1, 1.0)

    # 1) strict f32 check: prior + mask
    attn, attn_logprob = alignment_encoder_forward(
        params, queries, keys, mask=mask, attn_prior=attn_prior,
        mm_dtype=jnp.float32)
    jax.block_until_ready((attn, attn_logprob))
    ref_attn, ref_logp = reference_forward(params, queries, keys, mask,
                                           attn_prior, 0.0005)
    np.testing.assert_allclose(np.asarray(attn), np.asarray(ref_attn),
                               rtol=5e-4, atol=1e-5)
    np.testing.assert_allclose(np.asarray(attn_logprob), np.asarray(ref_logp),
                               rtol=1e-4, atol=1e-5)
    assert attn.shape == (B, 1, T1, T2) and attn_logprob.shape == (B, 1, T1, T2)

    # 2) strict f32 check: no prior, no mask (slim kernel variant)
    attn2, logp2 = alignment_encoder_forward(params, queries, keys,
                                             mask=None, attn_prior=None,
                                             mm_dtype=jnp.float32)
    jax.block_until_ready((attn2, logp2))
    ref_attn2, ref_logp2 = reference_forward(params, queries, keys, None,
                                             None, 0.0005)
    np.testing.assert_allclose(np.asarray(attn2), np.asarray(ref_attn2),
                               rtol=5e-4, atol=1e-5)
    np.testing.assert_allclose(np.asarray(logp2), np.asarray(ref_logp2),
                               rtol=1e-4, atol=1e-5)

    # 3) default bf16 perf path at a longer sequence: exercises the chunked
    #    conv loop, multi-tile T1 grid and the T1-only prior pad.
    T1b, T2b = 600, 40
    q_b = jax.random.normal(r_q2, (B, n_mel, T1b), jnp.float32)
    k_b = jax.random.normal(r_k2, (B, n_text, T2b), jnp.float32)
    key_lens_b = jnp.array([T2b, T2b - 5])
    mask_b = (jnp.arange(T2b)[None, :] >= key_lens_b[:, None])[:, :, None]
    prior_b = jax.random.uniform(r_p2, (B, T1b, T2b), jnp.float32, 0.1, 1.0)
    attn3, logp3 = alignment_encoder_forward(params, q_b, k_b, mask=mask_b,
                                             attn_prior=prior_b)  # bf16 default
    jax.block_until_ready((attn3, logp3))
    ref_attn3, ref_logp3 = reference_forward(params, q_b, k_b, mask_b,
                                             prior_b, 0.0005)
    np.testing.assert_allclose(np.asarray(attn3), np.asarray(ref_attn3),
                               rtol=1e-1, atol=2e-2)
    np.testing.assert_allclose(np.asarray(logp3), np.asarray(ref_logp3),
                               rtol=5e-2, atol=8e-2)
    assert attn3.shape == (B, 1, T1b, T2b)

    print("KERNEL_OK")
</pallas_src>

<mosaic_0001>
module attributes {stable_mosaic.version = 11 : i64} {
  func.func @_conv_chain_kernel(%arg0: i32, %arg1: memref<1x10x128xf32, #tpu.memory_space<vmem>>, %arg2: memref<3x128x128xf32, #tpu.memory_space<vmem>>, %arg3: memref<1x128xf32, #tpu.memory_space<vmem>>, %arg4: memref<128x128xf32, #tpu.memory_space<vmem>>, %arg5: memref<1x128xf32, #tpu.memory_space<vmem>>, %arg6: memref<1x8x128xf32, #tpu.memory_space<vmem>>) attributes {dimension_semantics = [#tpu.dimension_semantics<parallel>], iteration_bounds = array<i64: 2>, scalar_prefetch = 0 : i64, scratch_operands = 0 : i64, tpu.core_type = #tpu.core_type<tc>, window_params = [{transform_indices = @transform_0, window_bounds = array<i64: 1, 10, 128>}, {pipeline_mode = #tpu.pipeline_mode<synchronous>, transform_indices = @transform_1, window_bounds = array<i64: 3, 128, 128>}, {pipeline_mode = #tpu.pipeline_mode<synchronous>, transform_indices = @transform_2, window_bounds = array<i64: 1, 128>}, {pipeline_mode = #tpu.pipeline_mode<synchronous>, transform_indices = @transform_3, window_bounds = array<i64: 128, 128>}, {pipeline_mode = #tpu.pipeline_mode<synchronous>, transform_indices = @transform_4, window_bounds = array<i64: 1, 128>}, {transform_indices = @transform_5, window_bounds = array<i64: 1, 8, 128>}]} {
    %c0 = arith.constant 0 : index
    %c0_0 = arith.constant 0 : index
    %c0_1 = arith.constant 0 : index
    %0 = vector.load %arg1[%c0, %c0_0, %c0_1] : memref<1x10x128xf32, #tpu.memory_space<vmem>>, vector<1x10x128xf32>
    %1 = vector.shape_cast %0 : vector<1x10x128xf32> to vector<10x128xf32>
    %2 = vector.extract_strided_slice %1 {offsets = [0, 0], sizes = [8, 128], strides = [1, 1]} : vector<10x128xf32> to vector<8x128xf32>
    %c0_2 = arith.constant 0 : index
    %c0_3 = arith.constant 0 : index
    %c0_4 = arith.constant 0 : index
    %3 = vector.load %arg2[%c0_2, %c0_3, %c0_4] : memref<3x128x128xf32, #tpu.memory_space<vmem>>, vector<1x128x128xf32>
    %4 = vector.shape_cast %3 : vector<1x128x128xf32> to vector<128x128xf32>
    %cst = arith.constant dense<0.000000e+00> : vector<8x128xf32>
    %5 = tpu.matmul %2, %4, %cst {dimension_numbers = #tpu.dot_dimension_numbers<[1], [0], [0], [1], [0, 0, 1, 1], [], []>} : vector<8x128xf32>, vector<128x128xf32>, vector<8x128xf32> -> vector<8x128xf32>
    %6 = vector.extract_strided_slice %1 {offsets = [1, 0], sizes = [8, 128], strides = [1, 1]} : vector<10x128xf32> to vector<8x128xf32>
    %c1 = arith.constant 1 : index
    %c0_5 = arith.constant 0 : index
    %c0_6 = arith.constant 0 : index
    %7 = vector.load %arg2[%c1, %c0_5, %c0_6] : memref<3x128x128xf32, #tpu.memory_space<vmem>>, vector<1x128x128xf32>
    %8 = vector.shape_cast %7 : vector<1x128x128xf32> to vector<128x128xf32>
    %cst_7 = arith.constant dense<0.000000e+00> : vector<8x128xf32>
    %9 = tpu.matmul %6, %8, %cst_7 {dimension_numbers = #tpu.dot_dimension_numbers<[1], [0], [0], [1], [0, 0, 1, 1], [], []>} : vector<8x128xf32>, vector<128x128xf32>, vector<8x128xf32> -> vector<8x128xf32>
    %10 = arith.addf %5, %9 : vector<8x128xf32>
    %11 = vector.extract_strided_slice %1 {offsets = [2, 0], sizes = [8, 128], strides = [1, 1]} : vector<10x128xf32> to vector<8x128xf32>
    %c2 = arith.constant 2 : index
    %c0_8 = arith.constant 0 : index
    %c0_9 = arith.constant 0 : index
    %12 = vector.load %arg2[%c2, %c0_8, %c0_9] : memref<3x128x128xf32, #tpu.memory_space<vmem>>, vector<1x128x128xf32>
    %13 = vector.shape_cast %12 : vector<1x128x128xf32> to vector<128x128xf32>
    %cst_10 = arith.constant dense<0.000000e+00> : vector<8x128xf32>
    %14 = tpu.matmul %11, %13, %cst_10 {dimension_numbers = #tpu.dot_dimension_numbers<[1], [0], [0], [1], [0, 0, 1, 1], [], []>} : vector<8x128xf32>, vector<128x128xf32>, vector<8x128xf32> -> vector<8x128xf32>
    %15 = arith.addf %10, %14 : vector<8x128xf32>
    %c0_11 = arith.constant 0 : index
    %c0_12 = arith.constant 0 : index
    %16 = vector.load %arg3[%c0_11, %c0_12] : memref<1x128xf32, #tpu.memory_space<vmem>>, vector<1x128xf32>
    %17 = vector.broadcast %16 : vector<1x128xf32> to vector<8x128xf32>
    %18 = arith.addf %15, %17 : vector<8x128xf32>
    %cst_13 = arith.constant 0.000000e+00 : f32
    %19 = vector.broadcast %cst_13 : f32 to vector<8x128xf32>
    %20 = arith.maximumf %18, %19 : vector<8x128xf32>
    %c0_14 = arith.constant 0 : index
    %c0_15 = arith.constant 0 : index
    %21 = vector.load %arg4[%c0_14, %c0_15] : memref<128x128xf32, #tpu.memory_space<vmem>>, vector<128x128xf32>
    %cst_16 = arith.constant dense<0.000000e+00> : vector<8x128xf32>
    %22 = tpu.matmul %20, %21, %cst_16 {dimension_numbers = #tpu.dot_dimension_numbers<[1], [0], [0], [1], [0, 0, 1, 1], [], []>} : vector<8x128xf32>, vector<128x128xf32>, vector<8x128xf32> -> vector<8x128xf32>
    %c0_17 = arith.constant 0 : index
    %c0_18 = arith.constant 0 : index
    %23 = vector.load %arg5[%c0_17, %c0_18] : memref<1x128xf32, #tpu.memory_space<vmem>>, vector<1x128xf32>
    %24 = vector.broadcast %23 : vector<1x128xf32> to vector<8x128xf32>
    %25 = arith.addf %22, %24 : vector<8x128xf32>
    %c0_19 = arith.constant 0 : index
    %c0_20 = arith.constant 0 : index
    %c0_21 = arith.constant 0 : index
    %26 = vector.load %arg6[%c0_19, %c0_20, %c0_21] : memref<1x8x128xf32, #tpu.memory_space<vmem>>, vector<1x8x128xf32>
    %27 = vector.shape_cast %26 : vector<1x8x128xf32> to vector<8x128xf32>
    %28 = vector.shape_cast %25 : vector<8x128xf32> to vector<1x8x128xf32>
    tpu.vector_store %arg6[%c0_19, %c0_20, %c0_21], %28 {strides = array<i32>} : memref<1x8x128xf32, #tpu.memory_space<vmem>>, vector<1x8x128xf32>,
    return
  }
  func.func @transform_0(%arg0: i32) -> (i32, i32, i32) {
    %c0_i32 = arith.constant 0 : i32
    %c0_i32_0 = arith.constant 0 : i32
    %c0_i32_1 = arith.constant 0 : i32
    return %arg0, %c0_i32, %c0_i32_0 : i32, i32, i32
  }
  func.func @transform_1(%arg0: i32) -> (i32, i32, i32) {
    %c0_i32 = arith.constant 0 : i32
    %c0_i32_0 = arith.constant 0 : i32
    %c0_i32_1 = arith.constant 0 : i32
    %c0_i32_2 = arith.constant 0 : i32
    return %c0_i32, %c0_i32_0, %c0_i32_1 : i32, i32, i32
  }
  func.func @transform_2(%arg0: i32) -> (i32, i32) {
    %c0_i32 = arith.constant 0 : i32
    %c0_i32_0 = arith.constant 0 : i32
    %c0_i32_1 = arith.constant 0 : i32
    return %c0_i32, %c0_i32_0 : i32, i32
  }
  func.func @transform_3(%arg0: i32) -> (i32, i32) {
    %c0_i32 = arith.constant 0 : i32
    %c0_i32_0 = arith.constant 0 : i32
    %c0_i32_1 = arith.constant 0 : i32
    return %c0_i32, %c0_i32_0 : i32, i32
  }
  func.func @transform_4(%arg0: i32) -> (i32, i32) {
    %c0_i32 = arith.constant 0 : i32
    %c0_i32_0 = arith.constant 0 : i32
    %c0_i32_1 = arith.constant 0 : i32
    return %c0_i32, %c0_i32_0 : i32, i32
  }
  func.func @transform_5(%arg0: i32) -> (i32, i32, i32) {
    %c0_i32 = arith.constant 0 : i32
    %c0_i32_0 = arith.constant 0 : i32
    %c0_i32_1 = arith.constant 0 : i32
    return %arg0, %c0_i32, %c0_i32_0 : i32, i32, i32
  }
}

</mosaic_0001>

<bundles_post_ra>
// kernel: tpu_custom_call.1
= control target key start
LH: loop header
LB: loop body
LE: loop exit
PB: predicated region body
PF: predicated region fallthrough
CT: control target
= control target key end

     0   :  { %10 = vsyncpa [#allocation3], 0  ;;  %s1506_s0 = inlined_call_operand.vmem [shape: f32[2,10,128], index: 0, kind: input, shape index: {}]   ;;  %s1507_s1 = inlined_call_operand.hbm [shape: f32[3,128,128], index: 1, kind: input, shape index: {}]   ;;  %s1508_s2 = inlined_call_operand.vmem [shape: f32[1,128], index: 2, kind: input, shape index: {}]   ;;  %s1509_s3 = inlined_call_operand.hbm [shape: f32[128,128], index: 3, kind: input, shape index: {}]   ;;  %s1510_s4 = inlined_call_operand.vmem [shape: f32[1,128], index: 4, kind: input, shape index: {}]   ;;  %s1511_s5 = inlined_call_operand.hbm [shape: f32[2,8,128], index: 5, kind: output, shape index: {}]  }
   0x1   :  { %11 = vsyncpa [#allocation6], 0 }
   0x2   :  { %12 = vsyncpa [#allocation4], 0 }
   0x3   :  { %14 = vsyncpa [#allocation4 + $0x1], 0  ;;  %s1279_s18 = smov 0   ;;  %s1281_s19 = smov 0  }
   0x4   :  { %s1283_s20 = smov 0   ;;  %s1285_s21 = smov 0  }
   0x5 LB: > { %s1300_s22 = sadd.s32 4294967295, %s1239_s21   ;;  %s726_s23 = sadd.s32 4294967294, %s1239_s21   ;;  %s1239_s21 = sphi %s1285_s21, %s1529_s21   ;;  %s1235_s20 = sphi %s1283_s20, %s1528_s20   ;;  %s1231_s19 = sphi %s1281_s19, %s1527_s19   ;;  %s1227_s18 = sphi %s1279_s18, %s1526_s18  }
   0x6   : > { %s1304_s24 = sadd.s32 1, %s1239_s21   ;;  %s137_s25 = sadd.s32 1, %s1235_s20 }
   0x7   : > { %s134_s26 = ssub.s32 %s1239_s21, %s1304_s24  ;;  %p147_p0 = scmp.ne.s32.totalorder %s1235_s20, %s1231_s19 }
   0x8   : > { %p135_p1 = scmp.eq.s32.totalorder %s134_s26, 0  ;;  %p148_p2 = scmp.eq.s32.totalorder %s1300_s22, 1 }
   0x9   : > { %p153_p3 = scmp.ne.s32.totalorder %s1231_s19, %s1227_s18  ;;  %p154_p4 = scmp.eq.s32.totalorder %s726_s23, 1 }
   0xa   : > { %s1315_s27 = scalar_select %p135_p1, %s1235_s20, %s137_s25  }
   0xb   : > { %p1317_p5 = por %p148_p2, %p147_p0  ;;  %p1321_p6 = por %p154_p4, %p153_p3 }
   0xc   : > { %p727_p7 = scmp.ge.s32.totalorder %s1239_s21, 1  ;;  %p161_p8 = scmp.lt.s32.totalorder %s1239_s21, 3 }
   0xd   : > { %s1515_s28 = scalar_select %p1317_p5, 1, 0 }
   0xe   : > { %s1516_s29 = scalar_select %p1321_p6, 1, 0 }
   0xf   : > { %p1512_p9 = scmp.eq.s32.totalorder %s1300_s22, 0  ;;  %p1328_p10 = pnand %p727_p7, %p161_p8 }
  0x10   : > { %s1241_s6 = smov [#allocation2]   ;;  %s1242_s9 = smov [#allocation5]  }
  0x11   : > { %s1517_s30 = scalar_select %p1328_p10, 1, 0 }
  0x12   : > { %s173_s7 = sshll.u32 %s1241_s6, 4  ;;  %p1058_p11 = pneg %p1328_p10  ;;  %s174_s7 = int_to_ptr.vmem [resolvable:$true] %s173_s7 }
  0x13   : > { %s189_s10 = sshll.u32 %s1242_s9, 4  ;;  %s1113_s13 = scalar_lea.hbm %s1507_s1, 6144  ;;  %s1340_s10 = int_to_ptr.vmem [resolvable:$true] %s189_s10 }
  0x14   : > { %p1336_p12 = pnand %p1512_p9, %p1058_p11  ;;  %p1114_p13 = scmp.ne.s32.totalorder %s1507_s1, %s1113_s13 }
  0x15   : > { %p1120_p3 = scmp.lt.u32.totalorder %s1113_s13, %s1507_s1 }
  0x16   : > { %p1115_p0 = pneg %p1336_p12 }
  0x18   : > { %p1116_p1 = pnand %p1115_p0, %p1114_p13 }
  0x1a   : > { %p1117_p2 = pneg %p1116_p1 }
  0x1c   : > { %p1122_p4 = pnand %p1120_p3, %p1117_p2 }
  0x1e   : > { %1125 = shalt.err (!%p1122_p4)
}
  0x1f   : > { %s1126_s23 = scalar_lea.vmem %s174_s7, 6144  ;;  %p1134_p9 = scmp.lt.s32.totalorder %s174_s7, %s174_s7 }
  0x20   : > { %p1127_p7 = scmp.ne.s32.totalorder %s174_s7, %s1126_s23  ;;  %p1135_p6 = scmp.lt.s32.totalorder %s1126_s23, %s1126_s23 }
  0x22   : > { %p1129_p8 = pnand %p1127_p7, %p1115_p0  ;;  %p1136_p5 = por %p1135_p6, %p1134_p9 }
  0x24   : > { %p1130_p11 = pneg %p1129_p8 }
  0x26   : > { %p1137_p10 = pnand %p1136_p5, %p1130_p11 }
  0x28   : > { %1140 = shalt.err (!%p1137_p10)
}
  0x29   : > { %s1243_s25 = smov 128   ;;  %s1244_s26 = smov 8  }
  0x2a   : > { %1061 = dma.hbm_to_vmem [thread:$0]  (!%p1336_p12), %s1507_s1, 6144, %s174_s7, [#allocation3], %s1243_s25, %s1243_s25, %s1244_s26  }
  0x2b   : > { %s1141_s13 = scalar_lea.hbm %s1509_s3, 2048 }
  0x2c   : > { %p1142_p13 = scmp.ne.s32.totalorder %s1509_s3, %s1141_s13  ;;  %p1148_p9 = scmp.lt.u32.totalorder %s1141_s13, %s1509_s3 }
  0x2e   : > { %p1144_p5 = pnand %p1142_p13, %p1115_p0 }
  0x30   : > { %p1145_p6 = pneg %p1144_p5 }
  0x32   : > { %p1150_p10 = pnand %p1148_p9, %p1145_p6 }
  0x34   : > { %1153 = shalt.err (!%p1150_p10)
}
  0x35   : > { %s1154_s7 = scalar_lea.vmem %s1340_s10, 2048  ;;  %p1162_p4 = scmp.lt.s32.totalorder %s1340_s10, %s1340_s10 }
  0x36   : > { %p1155_p1 = scmp.ne.s32.totalorder %s1340_s10, %s1154_s7  ;;  %p1163_p7 = scmp.lt.s32.totalorder %s1154_s7, %s1154_s7 }
  0x38   : > { %p1157_p2 = pnand %p1155_p1, %p1115_p0  ;;  %p1164_p8 = por %p1163_p7, %p1162_p4 }
  0x3a   : > { %p1158_p3 = pneg %p1157_p2 }
  0x3c   : > { %p1165_p11 = pnand %p1164_p8, %p1158_p3 }
  0x3e   : > { %1168 = shalt.err (!%p1165_p11)
}
  0x3f   : > { %1064 = dma.hbm_to_vmem [thread:$0]  (!%p1336_p12), %s1509_s3, 2048, %s1340_s10, [#allocation6], %s1243_s25, %s1243_s25, %s1244_s26  }
  0x40   : > { %p1519_p13 = scmp.ne.s32.totalorder %s1517_s30, 0 }
  0x41   : > { %p1520_p5 = scmp.eq.s32.totalorder (!%p1519_p13), %s1300_s22, 0 }
  0x42   : > { %216 = sbr.rel (%p1519_p13) target bundleno = 591 (0x24f), region = 40 }
  0x49   : > { %1214 = dma.done.wait (%p1520_p5), [#allocation3], 6144   ;;  %p1521_p0 = pmov %p1520_p5 }
  0x4b   : > { %1216 = vsyncadd (%p1521_p0), [#allocation3], 4294961152  ;;  %p1522_p6 = pmov %p1521_p0 }
  0x4c   : > { %p1523_p9 = pmov %p1521_p0 }
  0x4d   : > { %1218 = dma.done.wait (%p1522_p6), [#allocation6], 2048  }
  0x4e   : > { %1220 = vsyncadd (%p1523_p9), [#allocation6], 4294965248  ;;  %v1245_v0 = vmov 0.0|0.0   ;;  %vm1246_vm0 = vmmov 0   ;;  %v1247_v1 = vmov 0.0   ;;  %v272_v2 = vld [vmem:[#allocation2 + $0x80] sm:$0xff] }
  0x4f   : > { %952 = vmatprep.subr.bf16.mxu0 %v1245_v0  ;;  %976 = vmatprep.subr.bf16.mxu1 %v1245_v0  ;;  %v273_v3 = vld [vmem:[#allocation2 + $0x88] sm:$0xff]  ;;  %v255_v4 = vld [vmem:[#allocation2] sm:$0xff]  ;;  %v274_v7 = vld [vmem:[#allocation2 + $0x90] sm:$0xff]  ;;  %p248_p12 = scmp.lt.s32.totalorder %s1300_s22, 1  ;;  %vm290_vm1 = vcmask 1046528   ;;  %vm452_vm2 = vcmask 1045504  }
  0x50   : > { %844 = vmatprep.mubr.msk.f32.mxu0 %vm1246_vm0, %v1247_v1  ;;  %879 = vmatprep.mubr.msk.f32.mxu1 %vm1246_vm0, %v1247_v1  ;;  %v953_v5 = vpack.c.bf16 %v273_v3, %v272_v2  ;;  %v256_v6 = vld [vmem:[#allocation2 + $0x8] sm:$0xff]  ;;  %v275_v8 = vld [vmem:[#allocation2 + $0x98] sm:$0xff]  ;;  %v257_v10 = vld [vmem:[#allocation2 + $0x10] sm:$0xff]  ;;  %s245_s12 = sand.u32 1, %s1231_s19   ;;  %s740_s16 = sshll.u32 %s1300_s22, 7 }
  0x51   : > { %v977_v9 = vpack.c.bf16 %v256_v6, %v255_v4  ;;  %v258_v11 = vld [vmem:[#allocation2 + $0x18] sm:$0xff]  ;;  %v956_v12 = vpack.c.bf16 %v275_v8, %v274_v7  ;;  %v276_v14 = vld [vmem:[#allocation2 + $0xa0] sm:$0xff]  ;;  %v277_v15 = vld [vmem:[#allocation2 + $0xa8] sm:$0xff]  ;;  %s249_s30 = scalar_select %p248_p12, %s1300_s22, 1 }
  0x52   : > { %954 = vmatpush3.bf16.msra.mxu0 %v953_v5  ;;  %v980_v13 = vpack.c.bf16 %v258_v11, %v257_v10  ;;  %v259_v16 = vld [vmem:[#allocation2 + $0x20] sm:$0xff]  ;;  %v260_v17 = vld [vmem:[#allocation2 + $0x28] sm:$0xff]  ;;  %v959_v18 = vpack.c.bf16 %v277_v15, %v276_v14  ;;  %v278_v20 = vld [vmem:[#allocation2 + $0xb0] sm:$0xff]  ;;  %s734_s13 = sshll.u32 %s245_s12, 3  ;;  %p1524_p1 = scmp.ne.s32.totalorder %s1515_s28, 0 }
  0x53   : > { %978 = vmatpush3.bf16.msra.mxu1 %v977_v9  ;;  %955 = vmatprep.subr.bf16.mxu0 %v1245_v0  ;;  %v983_v19 = vpack.c.bf16 %v260_v17, %v259_v16  ;;  %v279_v21 = vld [vmem:[#allocation2 + $0xb8] sm:$0xff]  ;;  %v261_v22 = vld [vmem:[#allocation2 + $0x30] sm:$0xff]  ;;  %v280_v26 = vld [vmem:[#allocation2 + $0xc0] sm:$0xff]  ;;  %s743_s8 = sshll.u32 %s249_s30, 4  ;;  %s247_s17 = scalar_lea.vmem [#allocation7], %s734_s13 }
  0x54   : > { %979 = vmatprep.subr.bf16.mxu1 %v1245_v0  ;;  %v262_v23 = vld [vmem:[#allocation2 + $0x38] sm:$0xff]  ;;  %v962_v24 = vpack.c.bf16 %v279_v21, %v278_v20  ;;  %v281_v27 = vld [vmem:[#allocation2 + $0xc8] sm:$0xff]  ;;  %v263_v28 = vld [vmem:[#allocation2 + $0x40] sm:$0xff]  ;;  %s252_s26 = scalar_lea.vmem %s1506_s0, %s743_s8  ;;  %s645_s7 = sshll.u32 %s247_s17, 4  ;;  %s1466_s7 = int_to_ptr.vmem [resolvable:$true] %s645_s7 }
  0x55   : > { %v986_v25 = vpack.c.bf16 %v262_v23, %v261_v22  ;;  %v264_v29 = vld [vmem:[#allocation2 + $0x48] sm:$0xff]  ;;  %v965_v30 = vpack.c.bf16 %v281_v27, %v280_v26  ;;  %v282_v32 = vld [vmem:[#allocation2 + $0xd0] sm:$0xff]  ;;  %v283_v33 = vld [vmem:[#allocation2 + $0xd8] sm:$0xff]  ;;  %s1464_s30 = scalar_lea.hbm %s1511_s5, %s740_s16  ;;  %s632_s8 = scalar_lea.sflag [#allocation4], %s245_s12 }
  0x56   : > { %957 = vmatpush3.bf16.msra.mxu0 %v956_v12  ;;  %v989_v31 = vpack.c.bf16 %v264_v29, %v263_v28  ;;  %v265_v34 = vld [vmem:[#allocation2 + $0x50] sm:$0xff]  ;;  %v266_v35 = vld [vmem:[#allocation2 + $0x58] sm:$0xff]  ;;  %v968_v36 = vpack.c.bf16 %v283_v33, %v282_v32  ;;  %v284_v38 = vld [vmem:[#allocation2 + $0xe0] sm:$0xff]  ;;  %s1169_s10 = scalar_lea.vmem %s1466_s7, 128  ;;  %s1248_s22 = smov [#allocation7]  }
  0x57   : > { %981 = vmatpush3.bf16.msra.mxu1 %v980_v13  ;;  %958 = vmatprep.subr.bf16.mxu0 %v1245_v0  ;;  %v992_v37 = vpack.c.bf16 %v266_v35, %v265_v34  ;;  %v285_v39 = vld [vmem:[#allocation2 + $0xe8] sm:$0xff]  ;;  %v267_v40 = vld [vmem:[#allocation2 + $0x60] sm:$0xff]  ;;  %v286_v43 = vld [vmem:[#allocation2 + $0xf0] sm:$0xff]  ;;  %p1170_p10 = scmp.ne.s32.totalorder %s1466_s7, %s1169_s10  ;;  %s1173_s25 = sshll.u32 %s1248_s22, 4  ;;  %s1174_s25 = int_to_ptr.vmem [resolvable:$false] %s1173_s25 }
  0x58   : > { %982 = vmatprep.subr.bf16.mxu1 %v1245_v0  ;;  %v268_v41 = vld [vmem:[#allocation2 + $0x68] sm:$0xff]  ;;  %v971_v42 = vpack.c.bf16 %v285_v39, %v284_v38  ;;  %v287_v45 = vld [vmem:[#allocation2 + $0xf8] sm:$0xff]  ;;  %v1421_v46 = vld [vmem:[%s252_s26] sm:$0xff]  ;;  %p1176_p4 = scmp.lt.s32.totalorder %s1466_s7, %s1174_s25 }
  0x59   : > { %v995_v44 = vpack.c.bf16 %v268_v41, %v267_v40  ;;  %v1423_v47 = vld [vmem:[%s252_s26 + $0x8] sm:$0x3]  ;;  %v269_v48 = vld [vmem:[#allocation2 + $0x70] sm:$0xff]  ;;  %v270_v49 = vld [vmem:[#allocation2 + $0x78] sm:$0xff]  ;;  %v974_v50 = vpack.c.bf16 %v287_v45, %v286_v43  ;;  %v291_v51 = vrot.slane %v1421_v46, 1  ;;  %v453_v16 = vrot.slane %v1421_v46, 2  ;;  %p1171_p2 = pnand %p1170_p10, %p1524_p1 }
  0x5a   : > { %960 = vmatpush3.bf16.msra.mxu0 %v959_v18  ;;  %v292_v52 = vrot.slane %v1423_v47, 1  ;;  %v998_v53 = vpack.c.bf16 %v270_v49, %v269_v48  ;;  %v436_v54 = vld [vmem:[#allocation2 + $0x100] sm:$0xff]  ;;  %v437_v55 = vld [vmem:[#allocation2 + $0x108] sm:$0xff]  ;;  %v438_v58 = vld [vmem:[#allocation2 + $0x110] sm:$0xff]  ;;  %v454_v17 = vrot.slane %v1423_v47, 2  ;;  %s1175_s26 = scalar_lea.vmem %s1174_s25, 256 }
  0x5b   : > { %984 = vmatpush3.bf16.msra.mxu1 %v983_v19  ;;  %961 = vmatprep.subr.bf16.mxu0 %v1245_v0  ;;  %v1001_v57 = vpack.c.bf16 %v437_v55, %v436_v54  ;;  %v439_v59 = vld [vmem:[#allocation2 + $0x118] sm:$0xff]  ;;  %v440_v61 = vld [vmem:[#allocation2 + $0x120] sm:$0xff]  ;;  %v441_v62 = vld [vmem:[#allocation2 + $0x128] sm:$0xff]  ;;  %p1172_p3 = pneg %p1171_p2  ;;  %p1177_p7 = scmp.lt.s32.totalorder %s1175_s26, %s1169_s10 }
  0x5c   : > { %985 = vmatprep.subr.bf16.mxu1 %v1245_v0  ;;  %v293_v56 = vsel %vm290_vm1, %v291_v51, %v292_v52  ;;  %v1004_v60 = vpack.c.bf16 %v439_v59, %v438_v58  ;;  %v1007_v63 = vpack.c.bf16 %v441_v62, %v440_v61  ;;  %v442_v2 = vld [vmem:[#allocation2 + $0x130] sm:$0xff]  ;;  %v443_v3 = vld [vmem:[#allocation2 + $0x138] sm:$0xff]  ;;  %v444_v5 = vld [vmem:[#allocation2 + $0x140] sm:$0xff]  ;;  %v455_v18 = vsel %vm452_vm2, %v453_v16, %v454_v17 }
  0x5d   : > { %v1010_v4 = vpack.c.bf16 %v443_v3, %v442_v2  ;;  %v445_v6 = vld [vmem:[#allocation2 + $0x148] sm:$0xff]  ;;  %v446_v8 = vld [vmem:[#allocation2 + $0x150] sm:$0xff]  ;;  %v447_v9 = vld [vmem:[#allocation2 + $0x158] sm:$0xff]  ;;  %p1178_p8 = por %p1177_p7, %p1176_p4 }
  0x5e   : > { %963 = vmatpush3.bf16.msra.mxu0 %v962_v24  ;;  %v1013_v7 = vpack.c.bf16 %v445_v6, %v444_v5  ;;  %v448_v10 = vld [vmem:[#allocation2 + $0x160] sm:$0xff]  ;;  %v449_v11 = vld [vmem:[#allocation2 + $0x168] sm:$0xff]  ;;  %v450_v13 = vld [vmem:[#allocation2 + $0x170] sm:$0xff] }
  0x5f   : > { %987 = vmatpush3.bf16.msra.mxu1 %v986_v25  ;;  %964 = vmatprep.subr.bf16.mxu0 %v1245_v0  ;;  %v1019_v12 = vpack.c.bf16 %v449_v11, %v448_v10  ;;  %v451_v14 = vld [vmem:[#allocation2 + $0x178] sm:$0xff]  ;;  %v537_v19 = vld [vmem:[#allocation5] sm:$0xff]  ;;  %v538_v20 = vld [vmem:[#allocation5 + $0x8] sm:$0xff]  ;;  %p1179_p11 = pnand %p1178_p8, %p1172_p3 }
  0x60   : > { %988 = vmatprep.subr.bf16.mxu1 %v1245_v0  ;;  %v1022_v15 = vpack.c.bf16 %v451_v14, %v450_v13  ;;  %v539_v21 = vld [vmem:[#allocation5 + $0x10] sm:$0xff]  ;;  %v1025_v22 = vpack.c.bf16 %v538_v20, %v537_v19  ;;  %v540_v23 = vld [vmem:[#allocation5 + $0x18] sm:$0xff]  ;;  %v541_v25 = vld [vmem:[#allocation5 + $0x20] sm:$0xff] }
  0x61   : > { %v1028_v24 = vpack.c.bf16 %v540_v23, %v539_v21  ;;  %v542_v26 = vld [vmem:[#allocation5 + $0x28] sm:$0xff]  ;;  %v543_v28 = vld [vmem:[#allocation5 + $0x30] sm:$0xff]  ;;  %v544_v29 = vld [vmem:[#allocation5 + $0x38] sm:$0xff] }
  0x62   : > { %966 = vmatpush3.bf16.msra.mxu0 %v965_v30  ;;  %v1031_v27 = vpack.c.bf16 %v542_v26, %v541_v25  ;;  %v1034_v30 = vpack.c.bf16 %v544_v29, %v543_v28  ;;  %v546_v32 = vld [vmem:[#allocation5 + $0x48] sm:$0xff]  ;;  %v547_v34 = vld [vmem:[#allocation5 + $0x50] sm:$0xff]  ;;  %v548_v35 = vld [vmem:[#allocation5 + $0x58] sm:$0xff] }
  0x63   : > { %990 = vmatpush3.bf16.msra.mxu1 %v989_v31  ;;  %967 = vmatprep.subr.bf16.mxu0 %v1245_v0  ;;  %v545_v31 = vld [vmem:[#allocation5 + $0x40] sm:$0xff]  ;;  %v550_v38 = vld [vmem:[#allocation5 + $0x68] sm:$0xff]  ;;  %v551_v40 = vld [vmem:[#allocation5 + $0x70] sm:$0xff] }
  0x64   : > { %991 = vmatprep.subr.bf16.mxu1 %v1245_v0  ;;  %v1037_v33 = vpack.c.bf16 %v546_v32, %v545_v31  ;;  %v552_v41 = vld [vmem:[#allocation5 + $0x78] sm:$0xff]  ;;  %v737_v49 = vld [vmem:[%s1508_s2] ss:$0 sm:$0xff] }
  0x66   : > { %969 = vmatpush3.bf16.msra.mxu0 %v968_v36  ;;  %v1040_v36 = vpack.c.bf16 %v548_v35, %v547_v34 }
  0x67   : > { %993 = vmatpush3.bf16.msra.mxu1 %v992_v37  ;;  %970 = vmatprep.subr.bf16.mxu0 %v1245_v0  ;;  %v549_v37 = vld [vmem:[#allocation5 + $0x60] sm:$0xff] }
  0x68   : > { %994 = vmatprep.subr.bf16.mxu1 %v1245_v0  ;;  %v1043_v39 = vpack.c.bf16 %v550_v38, %v549_v37 }
  0x6a   : > { %972 = vmatpush3.bf16.msra.mxu0 %v971_v42  ;;  %v1046_v42 = vpack.c.bf16 %v552_v41, %v551_v40 }
  0x6b   : > { %996 = vmatpush3.bf16.msra.mxu1 %v995_v44  ;;  %973 = vmatprep.subr.bf16.mxu0 %v1245_v0 }
  0x6c   : > { %997 = vmatprep.subr.bf16.mxu1 %v1245_v0 }
  0x6e   : > { %975 = vmatpush3.bf16.msra.mxu0 %v974_v50 }
  0x6f   : > { %999 = vmatpush3.bf16.msra.mxu1 %v998_v53  ;;  %1000 = vmatprep.subr.bf16.mxu0 %v1245_v0  ;;  %v738_v53 = vld [vmem:[%s1510_s4] ss:$0 sm:$0xff] }
  0x70   : > { %1024 = vmatprep.subr.bf16.mxu1 %v1245_v0 }
  0x71   : > { %845 = vmatmul.mubr.f32.vlgmr.msra.gmra.mrb[0].mxu0 %v293_v56 }
  0x72   : > { %880 = vmatmul.mubr.f32.vlgmr.msra.gmra.mrb[0].mxu1 %v1421_v46  ;;  %1002 = vmatpush3.bf16.msra.mxu0 %v1001_v57 }
  0x73   : > { %1003 = vmatprep.subr.bf16.mxu0 %v1245_v0  ;;  %914 = vmatprep.mubr.msk.f32.mxu0 %vm1246_vm0, %v1247_v1 }
  0x74   : > { %949 = vmatprep.mubr.msk.f32.mxu1 %vm1246_vm0, %v1247_v1  ;;  %v1016_v1 = vpack.c.bf16 %v447_v9, %v446_v8  ;;  %1026 = vmatpush3.bf16.msra.mxu1 %v1025_v22 }
  0x75   : > { %1027 = vmatprep.subr.bf16.mxu1 %v1245_v0 }
  0x76   : > { %1005 = vmatpush3.bf16.msra.mxu0 %v1004_v60 }
  0x77   : > { %1006 = vmatprep.subr.bf16.mxu0 %v1245_v0 }
  0x78   : > { %1029 = vmatpush3.bf16.msra.mxu1 %v1028_v24 }
  0x79   : > { %1030 = vmatprep.subr.bf16.mxu1 %v1245_v0 }
  0x7a   : > { %1008 = vmatpush3.bf16.msra.mxu0 %v1007_v63 }
  0x7b   : > { %1009 = vmatprep.subr.bf16.mxu0 %v1245_v0 }
  0x7c   : > { %1032 = vmatpush3.bf16.msra.mxu1 %v1031_v27 }
  0x7d   : > { %1033 = vmatprep.subr.bf16.mxu1 %v1245_v0 }
  0x7e   : > { %1011 = vmatpush3.bf16.msra.mxu0 %v1010_v4 }
  0x7f   : > { %1012 = vmatprep.subr.bf16.mxu0 %v1245_v0 }
  0x80   : > { %1035 = vmatpush3.bf16.msra.mxu1 %v1034_v30 }
  0x81   : > { %1036 = vmatprep.subr.bf16.mxu1 %v1245_v0 }
  0x82   : > { %1014 = vmatpush3.bf16.msra.mxu0 %v1013_v7 }
  0x83   : > { %1015 = vmatprep.subr.bf16.mxu0 %v1245_v0 }
  0x84   : > { %1038 = vmatpush3.bf16.msra.mxu1 %v1037_v33 }
  0x85   : > { %1039 = vmatprep.subr.bf16.mxu1 %v1245_v0 }
  0x86   : > { %1017 = vmatpush3.bf16.msra.mxu0 %v1016_v1 }
  0x87   : > { %1018 = vmatprep.subr.bf16.mxu0 %v1245_v0 }
  0x88   : > { %1041 = vmatpush3.bf16.msra.mxu1 %v1040_v36 }
  0x89   : > { %1042 = vmatprep.subr.bf16.mxu1 %v1245_v0 }
  0x8a   : > { %1020 = vmatpush3.bf16.msra.mxu0 %v1019_v12 }
  0x8b   : > { %1021 = vmatprep.subr.bf16.mxu0 %v1245_v0 }
  0x8c   : > { %1044 = vmatpush3.bf16.msra.mxu1 %v1043_v39 }
  0x8d   : > { %1045 = vmatprep.subr.bf16.mxu1 %v1245_v0 }
  0x8e   : > { %1023 = vmatpush3.bf16.msra.mxu0 %v1022_v15 }
  0x90   : > { %1047 = vmatpush3.bf16.msra.mxu1 %v1046_v42 }
  0x91   : > { %915 = vmatmul.mubr.f32.vlgmr.msra.gmra.mrb[2].mxu0 %v455_v18 }
 0x144   : > { %v361_v43 = vpop.f32.mrb[0].mxu0 }
 0x145   : > { %v846_v44 = vpop.f32.mrb[1].mxu0  ;;  %v431_v45 = vpop.f32.mrb[0].mxu1 }
 0x146   : > { %v432_v46 = vadd.f32 %v431_v45, %v361_v43  ;;  %v881_v47 = vpop.f32.mrb[1].mxu1 }
 0x164   : > { %v523_v48 = vpop.f32.mrb[2].mxu0 }
 0x165   : > { %v527_v50 = vadd.f32 %v523_v48, %v432_v46  ;;  %v916_v51 = vpop.f32.mrb[3].mxu0 }
 0x167   : > { %v535_v52 = vadd.f32 %v737_v49, %v527_v50 }
 0x169   : > { %v536_v0 = vmax.f32 %v535_v52, 0.0 }
 0x16b   : > { %950 = vmatmul.mubr.f32.vlgmr.msra.gmra.mrb[2].mxu1 %v536_v0 }
 0x23e   : > { %v626_v54 = vpop.f32.mrb[2].mxu1 }
 0x23f   : > { %v627_v55 = vadd.f32 %v738_v53, %v626_v54  ;;  %v951_v56 = vpop.f32.mrb[3].mxu1 }
 0x241   : > { %630 = vst [vmem:[%s247_s17] sm:$0xff] %v627_v55 }
 0x242   : > { %1182 = shalt.err (!%p1179_p11)
}
 0x243   : > { %s1183_s9 = scalar_lea.hbm %s1464_s30, 128  ;;  %s1187_s13 = scalar_lea.hbm %s1511_s5, 256 }
 0x244   : > { %p1184_p13 = scmp.ne.s32.totalorder %s1464_s30, %s1183_s9  ;;  %p1188_p6 = scmp.lt.u32.totalorder %s1464_s30, %s1511_s5 }
 0x245   : > { %p1189_p9 = scmp.lt.u32.totalorder %s1187_s13, %s1183_s9  ;;  %p1191_p10 = scmp.lt.u32.totalorder %s1183_s9, %s1464_s30 }
 0x246   : > { %p1185_p5 = pnand %p1184_p13, %p1524_p1 }
 0x247   : > { %p1190_p12 = por %p1189_p9, %p1188_p6 }
 0x248   : > { %p1186_p0 = pneg %p1185_p5 }
 0x249   : > { %p1192_p2 = por %p1191_p10, %p1190_p12 }
 0x24b   : > { %p1193_p3 = pnand %p1192_p2, %p1186_p0 }
 0x24d   : > { %1196 = shalt.err (!%p1193_p3)
}
 0x24e   : > { %1056 = dma.vmem_to_hbm [thread:$0]  (%p1524_p1), %s1466_s7, 128, %s1464_s30, %s632_s8  }
 0x24f PF: > { %p1073_p4 = scmp.ge.s32.totalorder %s1239_s21, 2  ;;  %s657_s16 = sand.u32 1, %s1227_s18  }
 0x250   : > { %p1525_p7 = scmp.ne.s32.totalorder %s1516_s29, 0  ;;  %s658_s17 = scalar_lea.sflag [#allocation4], %s657_s16 }
 0x252   : > { %p1066_p8 = pnand %p1073_p4, %p1525_p7 }
 0x254   : > { %1222 = dma.done.wait (!%p1066_p8), %s658_s17, 128  }
 0x255   : > { %1224 = vsyncadd (!%p1066_p8), %s658_s17, 4294967168  ;;  %p17_p11 = scmp.ge.s32.totalorder %s1304_s24, 4   ;;  %s1526_s18 = smov %s1231_s19 }
 0x256   : > { %s1527_s19 = smov %s1235_s20  ;;  %s1528_s20 = smov %s1315_s27 }
 0x257   : > { %s1529_s21 = smov %s1304_s24  ;;  %19 = sbr.rel (!%p17_p11) target bundleno = 5 (0x5), region = 86 }
 0x25e   :  { %663 = vsyncpa [#allocation3], 1 }
 0x25f   :  { %665 = vsyncpa [#allocation3 + $0x1], 1 }
 0x260   :  { %666 = vsyncpa [#allocation6], 1 }
 0x261   :  { %667 = vsyncpa [#allocation4], 1 }
 0x262   :  { %669 = vsyncpa [#allocation4 + $0x1], 1 }

</bundles_post_ra>
